<compile_context>
chip_gen: v6e
topology: v6e:2x2x1
jax: 0.10.0
libtpu: 0.0.40
codegen_flags: <defaults>
</compile_context>

<pallas_src>
import math
import functools

import jax
import jax.numpy as jnp
from jax import lax
from jax.experimental import pallas as pl
from jax.experimental.pallas import tpu as pltpu


def mha_kernel(q_ref, k_ref, v_ref,
               wq_ref, bq_ref, wk_ref, bk_ref, wv_ref, bv_ref, wo_ref, bo_ref,
               o_ref, kp_scr, vp_scr, ctx_scr,
               *, num_heads, d_k, scale, compute_dtype, approx_recip):
    """Fused Q/K/V projection + per-head attention + output projection.

    Grid is (batch, query-tile). The K/V projections for the current batch element are
    computed once (at query-tile 0) into persistent VMEM scratch and reused by all
    query tiles of that batch element.
    """
    # TODO(synk): the optional `mask` argument of forward() is not implemented
    # (this kernel covers the mask=None path only).
    cdt = compute_dtype

    # ---- K/V projection into persistent VMEM scratch, once per batch element --------
    @pl.when(pl.program_id(1) == 0)
    def _project_kv():
        kp = jnp.dot(k_ref[0], wk_ref[...], preferred_element_type=jnp.float32)
        vp = jnp.dot(v_ref[0], wv_ref[...], preferred_element_type=jnp.float32)
        kp_scr[...] = (kp + bk_ref[0]).astype(cdt)
        vp_scr[...] = (vp + bv_ref[0]).astype(cdt)

    # ---- Q projection for this (TQ, D) query tile ------------------------------------
    qp = jnp.dot(q_ref[0], wq_ref[...], preferred_element_type=jnp.float32)
    qp = (qp + bq_ref[0]) * scale                       # fold 1/sqrt(d_k) in once, f32

    # ---- per-head attention; contexts written head-by-head into a (TQ, D) slab ------
    for h in range(num_heads):                          # static unroll, H is small
        lo, hi = h * d_k, (h + 1) * d_k
        qh = qp[:, lo:hi].astype(cdt)                   # (TQ, d_k)
        kh = kp_scr[:, lo:hi]                           # (S, d_k)  per-head ref slice
        vh = vp_scr[:, lo:hi]                           # (S, d_k)

        # Scores: contract d_k of Q with d_k of K directly (no explicit transpose).
        s = lax.dot_general(qh, kh, (((1,), (1,)), ((), ())),
                            preferred_element_type=jnp.float32)     # (TQ, S) f32
        m = jnp.max(s, axis=-1, keepdims=True)
        p = jnp.exp(s - m)                              # unnormalized probs, f32
        l = jnp.sum(p, axis=-1, keepdims=True)          # (TQ, 1)

        ctx = lax.dot_general(p.astype(cdt), vh, (((1,), (0,)), ((), ())),
                              preferred_element_type=jnp.float32)   # (TQ, d_k) f32
        # Deferred softmax normalization: one (TQ, d_k) scale instead of a (TQ, S) divide.
        ctx = ctx * pl.reciprocal(l, approx=approx_recip)
        ctx_scr[:, lo:hi] = ctx.astype(cdt)

    # ---- single full-depth output projection (K = D contraction, one Wo push) -------
    out = jnp.dot(ctx_scr[...], wo_ref[...], preferred_element_type=jnp.float32)
    o_ref[0] = (out + bo_ref[0]).astype(o_ref.dtype)


def _vmem_capacity_bytes():
    """Per-core VMEM capacity; conservative fallback if the query is unavailable."""
    try:
        return int(pltpu.get_tpu_info().vmem_capacity_bytes)
    except Exception:
        return 64 * 1024 * 1024          # v7x per-TensorCore size; safe lower bound


def multi_head_attention(Q, K, V, params, *, num_heads, mask=None,
                         compute_dtype=jnp.bfloat16, q_tile=None):
    """Q, K, V: (B, S, D). params: (in,out)-layout weights and (D,) biases, float32.

    compute_dtype is the MXU operand dtype (bf16 default on all TPU generations);
    accumulation, biases and softmax math stay float32 inside the kernel.
    """
    assert mask is None  # TODO(synk): masked attention path not implemented.
    B, S, D = Q.shape
    assert D % num_heads == 0, "d_model must be divisible by num_heads"
    d_k = D // num_heads
    out_dtype = Q.dtype
    cdt = jnp.dtype(compute_dtype)

    # Generation-aware VMEM budget (v5e/v6e: 128 MiB, v7x: 64 MiB per core).
    vmem_cap = _vmem_capacity_bytes()
    vmem_limit = (vmem_cap * 3) // 4
    if q_tile is None:
        # Larger tiles amortize per-step overhead and weight pushes; scale with budget.
        q_tile = 512 if vmem_cap >= 96 * 1024 * 1024 else 256
    TQ = min(S, q_tile)
    # TODO(synk): ragged S (not divisible by the tile size) would need a masked tail tile.
    assert S % TQ == 0, "seq length must be divisible by the query tile"

    # Rough per-step VMEM footprint of the "full-S K/V resident" design.
    isz = cdt.itemsize
    osz = jnp.dtype(out_dtype).itemsize
    vmem_est = (2 * S * D * isz                    # kp/vp persistent scratch
                + 2 * 2 * S * D * isz              # raw K, V blocks (double-buffered)
                + 2 * 4 * D * D * isz              # 4 weight blocks (double-buffered)
                + 2 * TQ * D * (isz + osz)         # Q-in / out tiles (double-buffered)
                + TQ * S * 4 + 3 * TQ * D * 4)     # live f32 temporaries (scores, qp, ctx)
    # TODO(synk): beyond this budget, add a KV grid axis with a flash-style
    # online-softmax accumulator instead of keeping the full-S projections resident.
    assert vmem_est <= vmem_limit, (
        f"working set ~{vmem_est / 2**20:.1f} MiB exceeds VMEM budget "
        f"{vmem_limit / 2**20:.1f} MiB; needs flash-style KV tiling")

    # MXU operands in compute dtype (bf16 halves HBM/VMEM traffic on every generation);
    # biases stay f32 and are added to the f32 accumulators inside the kernel.
    Qc, Kc, Vc = (x.astype(cdt) for x in (Q, K, V))
    wq, wk, wv, wo = (params[n].astype(cdt) for n in ("wq", "wk", "wv", "wo"))
    bq, bk, bv, bo = (params[n].reshape(1, D).astype(jnp.float32)
                      for n in ("bq", "bk", "bv", "bo"))

    q_spec = pl.BlockSpec((1, TQ, D), lambda b, q: (b, q, 0))
    # Raw K/V kept full per batch element; the block index is constant across query
    # tiles, so the pipeline fetches each batch element's K/V exactly once.
    kv_spec = pl.BlockSpec((1, S, D), lambda b, q: (b, 0, 0))
    w_spec = pl.BlockSpec((D, D), lambda b, q: (0, 0))
    b_spec = pl.BlockSpec((1, D), lambda b, q: (0, 0))
    # (If VMEM-bound at large D, pipeline_mode=pl.Buffered(1) on the constant-index
    #  weight/bias blocks would halve their footprint; unnecessary at these budgets.)

    kernel = functools.partial(
        mha_kernel, num_heads=num_heads, d_k=d_k, scale=1.0 / math.sqrt(d_k),
        compute_dtype=cdt,
        # EUP-approx reciprocal on the low-precision default path; exact on f32 path.
        approx_recip=(cdt != jnp.dtype(jnp.float32)))

    return pl.pallas_call(
        kernel,
        out_shape=jax.ShapeDtypeStruct((B, S, D), out_dtype),
        grid_spec=pltpu.PrefetchScalarGridSpec(
            num_scalar_prefetch=0,
            grid=(B, S // TQ),
            in_specs=[q_spec, kv_spec, kv_spec,
                      w_spec, b_spec, w_spec, b_spec, w_spec, b_spec, w_spec, b_spec],
            out_specs=q_spec,
            scratch_shapes=[pltpu.VMEM((S, D), cdt),    # projected K (per batch element)
                            pltpu.VMEM((S, D), cdt),    # projected V (per batch element)
                            pltpu.VMEM((TQ, D), cdt)],  # head-concatenated context
        ),
        compiler_params=pltpu.CompilerParams(
            # Batch axis parallel (megacore / v7x dual-TC); query axis "arbitrary"
            # because the K/V projection scratch carries a dependency from query-tile 0.
            dimension_semantics=("parallel", "arbitrary"),
            vmem_limit_bytes=vmem_limit,
        ),
    )(Qc, Kc, Vc, wq, bq, wk, bk, wv, bv, wo, bo)


def reference_mha(Q, K, V, params, *, num_heads):
    """Pure-JAX reference mirroring the PyTorch module exactly (fp32)."""
    B, S, D = Q.shape
    d_k = D // num_heads

    def linear(x, w, b):   # w is (in, out)
        return x @ w + b

    def split_heads(x):
        return x.reshape(B, S, num_heads, d_k).transpose(0, 2, 1, 3)

    q = split_heads(linear(Q, params["wq"], params["bq"]))
    k = split_heads(linear(K, params["wk"], params["bk"]))
    v = split_heads(linear(V, params["wv"], params["bv"]))

    scores = jnp.einsum("bhqd,bhkd->bhqk", q, k) / math.sqrt(d_k)
    attn = jax.nn.softmax(scores, axis=-1)
    out = jnp.einsum("bhqk,bhkd->bhqd", attn, v)
    out = out.transpose(0, 2, 1, 3).reshape(B, S, D)
    return linear(out, params["wo"], params["bo"])


def make_params(key, D):
    keys = jax.random.split(key, 8)
    bound = 1.0 / math.sqrt(D)
    u = lambda k, shape: jax.random.uniform(k, shape, jnp.float32, -bound, bound)
    return {
        "wq": u(keys[0], (D, D)), "bq": u(keys[1], (D,)),
        "wk": u(keys[2], (D, D)), "bk": u(keys[3], (D,)),
        "wv": u(keys[4], (D, D)), "bv": u(keys[5], (D,)),
        "wo": u(keys[6], (D, D)), "bo": u(keys[7], (D,)),
    }


def run_case(key, *, B, S, D, H, compute_dtype, q_tile, atol, rtol, name):
    kp_, kq, kk, kv = jax.random.split(key, 4)
    params = make_params(kp_, D)
    Q = jax.random.normal(kq, (B, S, D), jnp.float32)
    K = jax.random.normal(kk, (B, S, D), jnp.float32)
    V = jax.random.normal(kv, (B, S, D), jnp.float32)

    out = multi_head_attention(Q, K, V, params, num_heads=H,
                               compute_dtype=compute_dtype, q_tile=q_tile)
    out = jax.block_until_ready(out)
    ref = reference_mha(Q, K, V, params, num_heads=H)
    assert out.shape == (B, S, D), f"{name}: bad output shape {out.shape}"
    assert jnp.allclose(out, ref, atol=atol, rtol=rtol), f"{name}: mismatch vs reference"


if __name__ == "__main__":
    root = jax.random.PRNGKey(0)
    k1, k2, k3 = jax.random.split(root, 3)

    # Small module-scale test (bf16 MXU operands by default, f32 accumulation).
    run_case(k1, B=2, S=8, D=32, H=4, compute_dtype=jnp.bfloat16, q_tile=None,
             atol=5e-2, rtol=5e-2, name="small_bf16")

    # f32 operand path with tight tolerance; two query tiles per batch element, so the
    # fused K/V-projection scratch persistence across the "arbitrary" q axis is exercised.
    run_case(k2, B=2, S=512, D=128, H=4, compute_dtype=jnp.float32, q_tile=256,
             atol=3e-3, rtol=3e-3, name="tiled_f32")

    # Default bf16 fast path at the same tiled shape (looser tolerance vs fp32 reference).
    run_case(k3, B=2, S=512, D=128, H=4, compute_dtype=jnp.bfloat16, q_tile=256,
             atol=5e-2, rtol=5e-2, name="tiled_bf16")

    print("KERNEL_OK")
</pallas_src>

<mosaic_0001>
module attributes {stable_mosaic.version = 11 : i64} {
  func.func @mha_kernel(%arg0: i32, %arg1: i32, %arg2: memref<1x8x32xbf16, #tpu.memory_space<vmem>>, %arg3: memref<1x8x32xbf16, #tpu.memory_space<vmem>>, %arg4: memref<1x8x32xbf16, #tpu.memory_space<vmem>>, %arg5: memref<32x32xbf16, #tpu.memory_space<vmem>>, %arg6: memref<1x32xf32, #tpu.memory_space<vmem>>, %arg7: memref<32x32xbf16, #tpu.memory_space<vmem>>, %arg8: memref<1x32xf32, #tpu.memory_space<vmem>>, %arg9: memref<32x32xbf16, #tpu.memory_space<vmem>>, %arg10: memref<1x32xf32, #tpu.memory_space<vmem>>, %arg11: memref<32x32xbf16, #tpu.memory_space<vmem>>, %arg12: memref<1x32xf32, #tpu.memory_space<vmem>>, %arg13: memref<1x8x32xf32, #tpu.memory_space<vmem>>, %arg14: memref<8x32xbf16, #tpu.memory_space<vmem>>, %arg15: memref<8x32xbf16, #tpu.memory_space<vmem>>, %arg16: memref<8x32xbf16, #tpu.memory_space<vmem>>) attributes {dimension_semantics = [#tpu.dimension_semantics<parallel>, #tpu.dimension_semantics<arbitrary>], iteration_bounds = array<i64: 2, 1>, scalar_prefetch = 0 : i64, scratch_operands = 3 : i64, tpu.core_type = #tpu.core_type<tc>, window_params = [{transform_indices = @transform_0, window_bounds = array<i64: 1, 8, 32>}, {transform_indices = @transform_1, window_bounds = array<i64: 1, 8, 32>}, {transform_indices = @transform_2, window_bounds = array<i64: 1, 8, 32>}, {pipeline_mode = #tpu.pipeline_mode<synchronous>, transform_indices = @transform_3, window_bounds = array<i64: 32, 32>}, {pipeline_mode = #tpu.pipeline_mode<synchronous>, transform_indices = @transform_4, window_bounds = array<i64: 1, 32>}, {pipeline_mode = #tpu.pipeline_mode<synchronous>, transform_indices = @transform_5, window_bounds = array<i64: 32, 32>}, {pipeline_mode = #tpu.pipeline_mode<synchronous>, transform_indices = @transform_6, window_bounds = array<i64: 1, 32>}, {pipeline_mode = #tpu.pipeline_mode<synchronous>, transform_indices = @transform_7, window_bounds = array<i64: 32, 32>}, {pipeline_mode = #tpu.pipeline_mode<synchronous>, transform_indices = @transform_8, window_bounds = array<i64: 1, 32>}, {pipeline_mode = #tpu.pipeline_mode<synchronous>, transform_indices = @transform_9, window_bounds = array<i64: 32, 32>}, {pipeline_mode = #tpu.pipeline_mode<synchronous>, transform_indices = @transform_10, window_bounds = array<i64: 1, 32>}, {transform_indices = @transform_11, window_bounds = array<i64: 1, 8, 32>}]} {
    %c0_i32 = arith.constant 0 : i32
    %0 = arith.cmpi eq, %arg1, %c0_i32 : i32
    %1 = arith.extui %0 : i1 to i32
    %c0_i32_0 = arith.constant 0 : i32
    %2 = arith.cmpi ne, %1, %c0_i32_0 : i32
    scf.if %2 {
      %c0_55 = arith.constant 0 : index
      %c0_56 = arith.constant 0 : index
      %c0_57 = arith.constant 0 : index
      %101 = vector.load %arg3[%c0_55, %c0_56, %c0_57] : memref<1x8x32xbf16, #tpu.memory_space<vmem>>, vector<1x8x32xbf16>
      %102 = vector.shape_cast %101 : vector<1x8x32xbf16> to vector<8x32xbf16>
      %c0_58 = arith.constant 0 : index
      %c0_59 = arith.constant 0 : index
      %103 = vector.load %arg7[%c0_58, %c0_59] : memref<32x32xbf16, #tpu.memory_space<vmem>>, vector<32x32xbf16>
      %cst_60 = arith.constant dense<0.000000e+00> : vector<8x32xf32>
      %104 = tpu.matmul %102, %103, %cst_60 {dimension_numbers = #tpu.dot_dimension_numbers<[1], [0], [0], [1], [0, 0, 1, 1], [], []>} : vector<8x32xbf16>, vector<32x32xbf16>, vector<8x32xf32> -> vector<8x32xf32>
      %c0_61 = arith.constant 0 : index
      %c0_62 = arith.constant 0 : index
      %c0_63 = arith.constant 0 : index
      %105 = vector.load %arg4[%c0_61, %c0_62, %c0_63] : memref<1x8x32xbf16, #tpu.memory_space<vmem>>, vector<1x8x32xbf16>
      %106 = vector.shape_cast %105 : vector<1x8x32xbf16> to vector<8x32xbf16>
      %c0_64 = arith.constant 0 : index
      %c0_65 = arith.constant 0 : index
      %107 = vector.load %arg9[%c0_64, %c0_65] : memref<32x32xbf16, #tpu.memory_space<vmem>>, vector<32x32xbf16>
      %cst_66 = arith.constant dense<0.000000e+00> : vector<8x32xf32>
      %108 = tpu.matmul %106, %107, %cst_66 {dimension_numbers = #tpu.dot_dimension_numbers<[1], [0], [0], [1], [0, 0, 1, 1], [], []>} : vector<8x32xbf16>, vector<32x32xbf16>, vector<8x32xf32> -> vector<8x32xf32>
      %c0_67 = arith.constant 0 : index
      %c0_68 = arith.constant 0 : index
      %109 = vector.load %arg8[%c0_67, %c0_68] : memref<1x32xf32, #tpu.memory_space<vmem>>, vector<1x32xf32>
      %110 = vector.shape_cast %109 : vector<1x32xf32> to vector<32xf32>
      %111 = vector.shape_cast %110 : vector<32xf32> to vector<1x32xf32>
      %112 = vector.broadcast %111 : vector<1x32xf32> to vector<8x32xf32>
      %113 = arith.addf %104, %112 : vector<8x32xf32>
      %114 = arith.truncf %113 : vector<8x32xf32> to vector<8x32xbf16>
      %c0_69 = arith.constant 0 : index
      %c0_70 = arith.constant 0 : index
      %115 = vector.load %arg14[%c0_69, %c0_70] : memref<8x32xbf16, #tpu.memory_space<vmem>>, vector<8x32xbf16>
      tpu.vector_store %arg14[%c0_69, %c0_70], %114 {strides = array<i32>} : memref<8x32xbf16, #tpu.memory_space<vmem>>, vector<8x32xbf16>,
      %c0_71 = arith.constant 0 : index
      %c0_72 = arith.constant 0 : index
      %116 = vector.load %arg10[%c0_71, %c0_72] : memref<1x32xf32, #tpu.memory_space<vmem>>, vector<1x32xf32>
      %117 = vector.shape_cast %116 : vector<1x32xf32> to vector<32xf32>
      %118 = vector.shape_cast %117 : vector<32xf32> to vector<1x32xf32>
      %119 = vector.broadcast %118 : vector<1x32xf32> to vector<8x32xf32>
      %120 = arith.addf %108, %119 : vector<8x32xf32>
      %121 = arith.truncf %120 : vector<8x32xf32> to vector<8x32xbf16>
      %c0_73 = arith.constant 0 : index
      %c0_74 = arith.constant 0 : index
      %122 = vector.load %arg15[%c0_73, %c0_74] : memref<8x32xbf16, #tpu.memory_space<vmem>>, vector<8x32xbf16>
      tpu.vector_store %arg15[%c0_73, %c0_74], %121 {strides = array<i32>} : memref<8x32xbf16, #tpu.memory_space<vmem>>, vector<8x32xbf16>,
    } else {
    }
    %c0 = arith.constant 0 : index
    %c0_1 = arith.constant 0 : index
    %c0_2 = arith.constant 0 : index
    %3 = vector.load %arg2[%c0, %c0_1, %c0_2] : memref<1x8x32xbf16, #tpu.memory_space<vmem>>, vector<1x8x32xbf16>
    %4 = vector.shape_cast %3 : vector<1x8x32xbf16> to vector<8x32xbf16>
    %c0_3 = arith.constant 0 : index
    %c0_4 = arith.constant 0 : index
    %5 = vector.load %arg5[%c0_3, %c0_4] : memref<32x32xbf16, #tpu.memory_space<vmem>>, vector<32x32xbf16>
    %cst = arith.constant dense<0.000000e+00> : vector<8x32xf32>
    %6 = tpu.matmul %4, %5, %cst {dimension_numbers = #tpu.dot_dimension_numbers<[1], [0], [0], [1], [0, 0, 1, 1], [], []>} : vector<8x32xbf16>, vector<32x32xbf16>, vector<8x32xf32> -> vector<8x32xf32>
    %c0_5 = arith.constant 0 : index
    %c0_6 = arith.constant 0 : index
    %7 = vector.load %arg6[%c0_5, %c0_6] : memref<1x32xf32, #tpu.memory_space<vmem>>, vector<1x32xf32>
    %8 = vector.shape_cast %7 : vector<1x32xf32> to vector<32xf32>
    %9 = vector.shape_cast %8 : vector<32xf32> to vector<1x32xf32>
    %10 = vector.broadcast %9 : vector<1x32xf32> to vector<8x32xf32>
    %11 = arith.addf %6, %10 : vector<8x32xf32>
    %cst_7 = arith.constant 0.353553385 : f32
    %12 = vector.broadcast %cst_7 : f32 to vector<8x32xf32>
    %13 = arith.mulf %11, %12 : vector<8x32xf32>
    %14 = vector.extract_strided_slice %13 {offsets = [0, 0], sizes = [8, 8], strides = [1, 1]} : vector<8x32xf32> to vector<8x8xf32>
    %15 = arith.truncf %14 : vector<8x8xf32> to vector<8x8xbf16>
    %c0_8 = arith.constant 0 : index
    %c0_9 = arith.constant 0 : index
    %16 = vector.load %arg14[%c0_8, %c0_9] : memref<8x32xbf16, #tpu.memory_space<vmem>>, vector<8x8xbf16>
    %c0_10 = arith.constant 0 : index
    %c0_11 = arith.constant 0 : index
    %17 = vector.load %arg15[%c0_10, %c0_11] : memref<8x32xbf16, #tpu.memory_space<vmem>>, vector<8x8xbf16>
    %cst_12 = arith.constant dense<0.000000e+00> : vector<8x8xf32>
    %18 = tpu.matmul %15, %16, %cst_12 {dimension_numbers = #tpu.dot_dimension_numbers<[1], [1], [0], [0], [0, 0, 1, 0], [], []>} : vector<8x8xbf16>, vector<8x8xbf16>, vector<8x8xf32> -> vector<8x8xf32>
    %cst_13 = arith.constant dense<0xFF800000> : vector<8xf32>
    %19 = vector.multi_reduction <maximumf>, %18, %cst_13 [1] : vector<8x8xf32> to vector<8xf32>
    %20 = vector.shape_cast %19 : vector<8xf32> to vector<8x1xf32>
    %21 = vector.broadcast %20 : vector<8x1xf32> to vector<8x8xf32>
    %22 = arith.subf %18, %21 : vector<8x8xf32>
    %23 = math.exp %22 : vector<8x8xf32>
    %cst_14 = arith.constant dense<0.000000e+00> : vector<8xf32>
    %24 = vector.multi_reduction <add>, %23, %cst_14 [1] : vector<8x8xf32> to vector<8xf32>
    %25 = vector.shape_cast %24 : vector<8xf32> to vector<8x1xf32>
    %26 = arith.truncf %23 : vector<8x8xf32> to vector<8x8xbf16>
    %cst_15 = arith.constant dense<0.000000e+00> : vector<8x8xf32>
    %27 = tpu.matmul %26, %17, %cst_15 {dimension_numbers = #tpu.dot_dimension_numbers<[1], [0], [0], [1], [0, 0, 1, 1], [], []>} : vector<8x8xbf16>, vector<8x8xbf16>, vector<8x8xf32> -> vector<8x8xf32>
    %28 = tpu.reciprocal %25 {approx = true} : vector<8x1xf32> -> vector<8x1xf32>
    %29 = vector.broadcast %28 : vector<8x1xf32> to vector<8x8xf32>
    %30 = arith.mulf %27, %29 : vector<8x8xf32>
    %31 = arith.truncf %30 : vector<8x8xf32> to vector<8x8xbf16>
    %c0_16 = arith.constant 0 : index
    %c0_17 = arith.constant 0 : index
    %32 = vector.load %arg16[%c0_16, %c0_17] : memref<8x32xbf16, #tpu.memory_space<vmem>>, vector<8x8xbf16>
    tpu.vector_store %arg16[%c0_16, %c0_17], %31 {strides = array<i32>} : memref<8x32xbf16, #tpu.memory_space<vmem>>, vector<8x8xbf16>,
    %33 = vector.extract_strided_slice %13 {offsets = [0, 8], sizes = [8, 8], strides = [1, 1]} : vector<8x32xf32> to vector<8x8xf32>
    %34 = arith.truncf %33 : vector<8x8xf32> to vector<8x8xbf16>
    %c0_18 = arith.constant 0 : index
    %c8 = arith.constant 8 : index
    %35 = vector.load %arg14[%c0_18, %c8] : memref<8x32xbf16, #tpu.memory_space<vmem>>, vector<8x8xbf16>
    %c0_19 = arith.constant 0 : index
    %c8_20 = arith.constant 8 : index
    %36 = vector.load %arg15[%c0_19, %c8_20] : memref<8x32xbf16, #tpu.memory_space<vmem>>, vector<8x8xbf16>
    %cst_21 = arith.constant dense<0.000000e+00> : vector<8x8xf32>
    %37 = tpu.matmul %34, %35, %cst_21 {dimension_numbers = #tpu.dot_dimension_numbers<[1], [1], [0], [0], [0, 0, 1, 0], [], []>} : vector<8x8xbf16>, vector<8x8xbf16>, vector<8x8xf32> -> vector<8x8xf32>
    %cst_22 = arith.constant dense<0xFF800000> : vector<8xf32>
    %38 = vector.multi_reduction <maximumf>, %37, %cst_22 [1] : vector<8x8xf32> to vector<8xf32>
    %39 = vector.shape_cast %38 : vector<8xf32> to vector<8x1xf32>
    %40 = vector.broadcast %39 : vector<8x1xf32> to vector<8x8xf32>
    %41 = arith.subf %37, %40 : vector<8x8xf32>
    %42 = math.exp %41 : vector<8x8xf32>
    %cst_23 = arith.constant dense<0.000000e+00> : vector<8xf32>
    %43 = vector.multi_reduction <add>, %42, %cst_23 [1] : vector<8x8xf32> to vector<8xf32>
    %44 = vector.shape_cast %43 : vector<8xf32> to vector<8x1xf32>
    %45 = arith.truncf %42 : vector<8x8xf32> to vector<8x8xbf16>
    %cst_24 = arith.constant dense<0.000000e+00> : vector<8x8xf32>
    %46 = tpu.matmul %45, %36, %cst_24 {dimension_numbers = #tpu.dot_dimension_numbers<[1], [0], [0], [1], [0, 0, 1, 1], [], []>} : vector<8x8xbf16>, vector<8x8xbf16>, vector<8x8xf32> -> vector<8x8xf32>
    %47 = tpu.reciprocal %44 {approx = true} : vector<8x1xf32> -> vector<8x1xf32>
    %48 = vector.broadcast %47 : vector<8x1xf32> to vector<8x8xf32>
    %49 = arith.mulf %46, %48 : vector<8x8xf32>
    %50 = arith.truncf %49 : vector<8x8xf32> to vector<8x8xbf16>
    %c0_25 = arith.constant 0 : index
    %c8_26 = arith.constant 8 : index
    %51 = vector.load %arg16[%c0_25, %c8_26] : memref<8x32xbf16, #tpu.memory_space<vmem>>, vector<8x8xbf16>
    tpu.vector_store %arg16[%c0_25, %c8_26], %50 {strides = array<i32>} : memref<8x32xbf16, #tpu.memory_space<vmem>>, vector<8x8xbf16>,
    %52 = vector.extract_strided_slice %13 {offsets = [0, 16], sizes = [8, 8], strides = [1, 1]} : vector<8x32xf32> to vector<8x8xf32>
    %53 = arith.truncf %52 : vector<8x8xf32> to vector<8x8xbf16>
    %c0_27 = arith.constant 0 : index
    %c16 = arith.constant 16 : index
    %54 = vector.load %arg14[%c0_27, %c16] : memref<8x32xbf16, #tpu.memory_space<vmem>>, vector<8x8xbf16>
    %c0_28 = arith.constant 0 : index
    %c16_29 = arith.constant 16 : index
    %55 = vector.load %arg15[%c0_28, %c16_29] : memref<8x32xbf16, #tpu.memory_space<vmem>>, vector<8x8xbf16>
    %cst_30 = arith.constant dense<0.000000e+00> : vector<8x8xf32>
    %56 = tpu.matmul %53, %54, %cst_30 {dimension_numbers = #tpu.dot_dimension_numbers<[1], [1], [0], [0], [0, 0, 1, 0], [], []>} : vector<8x8xbf16>, vector<8x8xbf16>, vector<8x8xf32> -> vector<8x8xf32>
    %cst_31 = arith.constant dense<0xFF800000> : vector<8xf32>
    %57 = vector.multi_reduction <maximumf>, %56, %cst_31 [1] : vector<8x8xf32> to vector<8xf32>
    %58 = vector.shape_cast %57 : vector<8xf32> to vector<8x1xf32>
    %59 = vector.broadcast %58 : vector<8x1xf32> to vector<8x8xf32>
    %60 = arith.subf %56, %59 : vector<8x8xf32>
    %61 = math.exp %60 : vector<8x8xf32>
    %cst_32 = arith.constant dense<0.000000e+00> : vector<8xf32>
    %62 = vector.multi_reduction <add>, %61, %cst_32 [1] : vector<8x8xf32> to vector<8xf32>
    %63 = vector.shape_cast %62 : vector<8xf32> to vector<8x1xf32>
    %64 = arith.truncf %61 : vector<8x8xf32> to vector<8x8xbf16>
    %cst_33 = arith.constant dense<0.000000e+00> : vector<8x8xf32>
    %65 = tpu.matmul %64, %55, %cst_33 {dimension_numbers = #tpu.dot_dimension_numbers<[1], [0], [0], [1], [0, 0, 1, 1], [], []>} : vector<8x8xbf16>, vector<8x8xbf16>, vector<8x8xf32> -> vector<8x8xf32>
    %66 = tpu.reciprocal %63 {approx = true} : vector<8x1xf32> -> vector<8x1xf32>
    %67 = vector.broadcast %66 : vector<8x1xf32> to vector<8x8xf32>
    %68 = arith.mulf %65, %67 : vector<8x8xf32>
    %69 = arith.truncf %68 : vector<8x8xf32> to vector<8x8xbf16>
    %c0_34 = arith.constant 0 : index
    %c16_35 = arith.constant 16 : index
    %70 = vector.load %arg16[%c0_34, %c16_35] : memref<8x32xbf16, #tpu.memory_space<vmem>>, vector<8x8xbf16>
    tpu.vector_store %arg16[%c0_34, %c16_35], %69 {strides = array<i32>} : memref<8x32xbf16, #tpu.memory_space<vmem>>, vector<8x8xbf16>,
    %71 = vector.extract_strided_slice %13 {offsets = [0, 24], sizes = [8, 8], strides = [1, 1]} : vector<8x32xf32> to vector<8x8xf32>
    %72 = arith.truncf %71 : vector<8x8xf32> to vector<8x8xbf16>
    %c0_36 = arith.constant 0 : index
    %c24 = arith.constant 24 : index
    %73 = vector.load %arg14[%c0_36, %c24] : memref<8x32xbf16, #tpu.memory_space<vmem>>, vector<8x8xbf16>
    %c0_37 = arith.constant 0 : index
    %c24_38 = arith.constant 24 : index
    %74 = vector.load %arg15[%c0_37, %c24_38] : memref<8x32xbf16, #tpu.memory_space<vmem>>, vector<8x8xbf16>
    %cst_39 = arith.constant dense<0.000000e+00> : vector<8x8xf32>
    %75 = tpu.matmul %72, %73, %cst_39 {dimension_numbers = #tpu.dot_dimension_numbers<[1], [1], [0], [0], [0, 0, 1, 0], [], []>} : vector<8x8xbf16>, vector<8x8xbf16>, vector<8x8xf32> -> vector<8x8xf32>
    %cst_40 = arith.constant dense<0xFF800000> : vector<8xf32>
    %76 = vector.multi_reduction <maximumf>, %75, %cst_40 [1] : vector<8x8xf32> to vector<8xf32>
    %77 = vector.shape_cast %76 : vector<8xf32> to vector<8x1xf32>
    %78 = vector.broadcast %77 : vector<8x1xf32> to vector<8x8xf32>
    %79 = arith.subf %75, %78 : vector<8x8xf32>
    %80 = math.exp %79 : vector<8x8xf32>
    %cst_41 = arith.constant dense<0.000000e+00> : vector<8xf32>
    %81 = vector.multi_reduction <add>, %80, %cst_41 [1] : vector<8x8xf32> to vector<8xf32>
    %82 = vector.shape_cast %81 : vector<8xf32> to vector<8x1xf32>
    %83 = arith.truncf %80 : vector<8x8xf32> to vector<8x8xbf16>
    %cst_42 = arith.constant dense<0.000000e+00> : vector<8x8xf32>
    %84 = tpu.matmul %83, %74, %cst_42 {dimension_numbers = #tpu.dot_dimension_numbers<[1], [0], [0], [1], [0, 0, 1, 1], [], []>} : vector<8x8xbf16>, vector<8x8xbf16>, vector<8x8xf32> -> vector<8x8xf32>
    %85 = tpu.reciprocal %82 {approx = true} : vector<8x1xf32> -> vector<8x1xf32>
    %86 = vector.broadcast %85 : vector<8x1xf32> to vector<8x8xf32>
    %87 = arith.mulf %84, %86 : vector<8x8xf32>
    %88 = arith.truncf %87 : vector<8x8xf32> to vector<8x8xbf16>
    %c0_43 = arith.constant 0 : index
    %c24_44 = arith.constant 24 : index
    %89 = vector.load %arg16[%c0_43, %c24_44] : memref<8x32xbf16, #tpu.memory_space<vmem>>, vector<8x8xbf16>
    tpu.vector_store %arg16[%c0_43, %c24_44], %88 {strides = array<i32>} : memref<8x32xbf16, #tpu.memory_space<vmem>>, vector<8x8xbf16>,
    %c0_45 = arith.constant 0 : index
    %c0_46 = arith.constant 0 : index
    %90 = vector.load %arg16[%c0_45, %c0_46] : memref<8x32xbf16, #tpu.memory_space<vmem>>, vector<8x32xbf16>
    %c0_47 = arith.constant 0 : index
    %c0_48 = arith.constant 0 : index
    %91 = vector.load %arg11[%c0_47, %c0_48] : memref<32x32xbf16, #tpu.memory_space<vmem>>, vector<32x32xbf16>
    %cst_49 = arith.constant dense<0.000000e+00> : vector<8x32xf32>
    %92 = tpu.matmul %90, %91, %cst_49 {dimension_numbers = #tpu.dot_dimension_numbers<[1], [0], [0], [1], [0, 0, 1, 1], [], []>} : vector<8x32xbf16>, vector<32x32xbf16>, vector<8x32xf32> -> vector<8x32xf32>
    %c0_50 = arith.constant 0 : index
    %c0_51 = arith.constant 0 : index
    %93 = vector.load %arg12[%c0_50, %c0_51] : memref<1x32xf32, #tpu.memory_space<vmem>>, vector<1x32xf32>
    %94 = vector.shape_cast %93 : vector<1x32xf32> to vector<32xf32>
    %95 = vector.shape_cast %94 : vector<32xf32> to vector<1x32xf32>
    %96 = vector.broadcast %95 : vector<1x32xf32> to vector<8x32xf32>
    %97 = arith.addf %92, %96 : vector<8x32xf32>
    %c0_52 = arith.constant 0 : index
    %c0_53 = arith.constant 0 : index
    %c0_54 = arith.constant 0 : index
    %98 = vector.load %arg13[%c0_52, %c0_53, %c0_54] : memref<1x8x32xf32, #tpu.memory_space<vmem>>, vector<1x8x32xf32>
    %99 = vector.shape_cast %98 : vector<1x8x32xf32> to vector<8x32xf32>
    %100 = vector.shape_cast %97 : vector<8x32xf32> to vector<1x8x32xf32>
    tpu.vector_store %arg13[%c0_52, %c0_53, %c0_54], %100 {strides = array<i32>} : memref<1x8x32xf32, #tpu.memory_space<vmem>>, vector<1x8x32xf32>,
    return
  }
  func.func @transform_0(%arg0: i32, %arg1: i32) -> (i32, i32, i32) {
    %c0_i32 = arith.constant 0 : i32
    %c0_i32_0 = arith.constant 0 : i32
    return %arg0, %arg1, %c0_i32 : i32, i32, i32
  }
  func.func @transform_1(%arg0: i32, %arg1: i32) -> (i32, i32, i32) {
    %c0_i32 = arith.constant 0 : i32
    %c0_i32_0 = arith.constant 0 : i32
    %c0_i32_1 = arith.constant 0 : i32
    return %arg0, %c0_i32, %c0_i32_0 : i32, i32, i32
  }
  func.func @transform_2(%arg0: i32, %arg1: i32) -> (i32, i32, i32) {
    %c0_i32 = arith.constant 0 : i32
    %c0_i32_0 = arith.constant 0 : i32
    %c0_i32_1 = arith.constant 0 : i32
    return %arg0, %c0_i32, %c0_i32_0 : i32, i32, i32
  }
  func.func @transform_3(%arg0: i32, %arg1: i32) -> (i32, i32) {
    %c0_i32 = arith.constant 0 : i32
    %c0_i32_0 = arith.constant 0 : i32
    %c0_i32_1 = arith.constant 0 : i32
    return %c0_i32, %c0_i32_0 : i32, i32
  }
  func.func @transform_4(%arg0: i32, %arg1: i32) -> (i32, i32) {
    %c0_i32 = arith.constant 0 : i32
    %c0_i32_0 = arith.constant 0 : i32
    %c0_i32_1 = arith.constant 0 : i32
    return %c0_i32, %c0_i32_0 : i32, i32
  }
  func.func @transform_5(%arg0: i32, %arg1: i32) -> (i32, i32) {
    %c0_i32 = arith.constant 0 : i32
    %c0_i32_0 = arith.constant 0 : i32
    %c0_i32_1 = arith.constant 0 : i32
    return %c0_i32, %c0_i32_0 : i32, i32
  }
  func.func @transform_6(%arg0: i32, %arg1: i32) -> (i32, i32) {
    %c0_i32 = arith.constant 0 : i32
    %c0_i32_0 = arith.constant 0 : i32
    %c0_i32_1 = arith.constant 0 : i32
    return %c0_i32, %c0_i32_0 : i32, i32
  }
  func.func @transform_7(%arg0: i32, %arg1: i32) -> (i32, i32) {
    %c0_i32 = arith.constant 0 : i32
    %c0_i32_0 = arith.constant 0 : i32
    %c0_i32_1 = arith.constant 0 : i32
    return %c0_i32, %c0_i32_0 : i32, i32
  }
  func.func @transform_8(%arg0: i32, %arg1: i32) -> (i32, i32) {
    %c0_i32 = arith.constant 0 : i32
    %c0_i32_0 = arith.constant 0 : i32
    %c0_i32_1 = arith.constant 0 : i32
    return %c0_i32, %c0_i32_0 : i32, i32
  }
  func.func @transform_9(%arg0: i32, %arg1: i32) -> (i32, i32) {
    %c0_i32 = arith.constant 0 : i32
    %c0_i32_0 = arith.constant 0 : i32
    %c0_i32_1 = arith.constant 0 : i32
    return %c0_i32, %c0_i32_0 : i32, i32
  }
  func.func @transform_10(%arg0: i32, %arg1: i32) -> (i32, i32) {
    %c0_i32 = arith.constant 0 : i32
    %c0_i32_0 = arith.constant 0 : i32
    %c0_i32_1 = arith.constant 0 : i32
    return %c0_i32, %c0_i32_0 : i32, i32
  }
  func.func @transform_11(%arg0: i32, %arg1: i32) -> (i32, i32, i32) {
    %c0_i32 = arith.constant 0 : i32
    %c0_i32_0 = arith.constant 0 : i32
    return %arg0, %arg1, %c0_i32 : i32, i32, i32
  }
}

</mosaic_0001>

<bundles_post_ra>
// kernel: tpu_custom_call.1
= control target key start
LH: loop header
LB: loop body
LE: loop exit
PB: predicated region body
PF: predicated region fallthrough
CT: control target
= control target key end

     0   :  { %s2677_s0 = inlined_call_operand.hbm [shape: bf16[2,8,32], index: 0, kind: input, shape index: {}]   ;;  %s2678_s1 = inlined_call_operand.hbm [shape: bf16[2,8,32], index: 1, kind: input, shape index: {}]   ;;  %s2679_s2 = inlined_call_operand.hbm [shape: bf16[2,8,32], index: 2, kind: input, shape index: {}]   ;;  %s2680_s3 = inlined_call_operand.hbm [shape: bf16[32,32], index: 3, kind: input, shape index: {}]   ;;  %s2681_s4 = inlined_call_operand.hbm [shape: f32[1,32], index: 4, kind: input, shape index: {}]   ;;  %s2682_s5 = inlined_call_operand.hbm [shape: bf16[32,32], index: 5, kind: input, shape index: {}]   ;;  %s2683_s6 = inlined_call_operand.hbm [shape: f32[1,32], index: 6, kind: input, shape index: {}]   ;;  %s2684_s7 = inlined_call_operand.hbm [shape: bf16[32,32], index: 7, kind: input, shape index: {}]   ;;  %s2685_s8 = inlined_call_operand.hbm [shape: f32[1,32], index: 8, kind: input, shape index: {}]   ;;  %s2686_s9 = inlined_call_operand.vmem [shape: bf16[32,32], index: 9, kind: input, shape index: {}]   ;;  %s2687_s10 = inlined_call_operand.vmem [shape: f32[1,32], index: 10, kind: input, shape index: {}]   ;;  %s2688_s11 = inlined_call_operand.hbm [shape: f32[2,8,32], index: 11, kind: output, shape index: {}]  }
   0x1   :  { %2704 = sst [smem:[#allocation33_spill]] %s2680_s3 }
   0x2   :  { %2705 = sst [smem:[#allocation34_spill]] %s2682_s5 }
   0x3   :  { %2706 = sst [smem:[#allocation35_spill]] %s2684_s7 }
   0x4   :  { %2707 = sst [smem:[#allocation36_spill]] %s2687_s10 }
   0x5   :  { %2708 = sst [smem:[#allocation37_spill]] %s2688_s11 }
   0x6   :  { %16 = vsyncpa [#allocation6], 0 }
   0x7   :  { %18 = vsyncpa [#allocation6 + $0x1], 0 }
   0x8   :  { %19 = vsyncpa [#allocation9], 0 }
   0x9   :  { %21 = vsyncpa [#allocation9 + $0x1], 0 }
   0xa   :  { %22 = vsyncpa [#allocation12], 0 }
   0xb   :  { %23 = vsyncpa [#allocation15], 0 }
   0xc   :  { %24 = vsyncpa [#allocation18], 0 }
   0xd   :  { %25 = vsyncpa [#allocation7], 0 }
   0xe   :  { %27 = vsyncpa [#allocation7 + $0x1], 0  ;;  %s2308_s17 = smov 0   ;;  %s2310_s18 = smov 0  }
   0xf   :  { %s2312_s19 = smov 0   ;;  %s2314_s20 = smov 0  }
  0x10   :  { %s2316_s21 = smov 0   ;;  %s2318_s22 = smov 0  }
  0x11 LB: > { %2709 = sst [smem:[#allocation27_spill]] %s2206_s17  ;;  %s2339_s23 = sadd.s32 4294967295, %s2226_s22   ;;  %s2226_s22 = sphi %s2318_s22, %s33_s22   ;;  %s2222_s21 = sphi %s2316_s21, %s2749_s21   ;;  %s2218_s20 = sphi %s2314_s20, %s2748_s20   ;;  %s2214_s19 = sphi %s2312_s19, %s2752_s19   ;;  %s2210_s18 = sphi %s2310_s18, %s2751_s18   ;;  %s2206_s17 = sphi %s2308_s17, %s2750_s17  }
  0x12   : > { %2710 = sst [smem:[#allocation28_spill]] %s2222_s21  ;;  %p1544_p0 = scmp.ge.s32.totalorder %s2226_s22, 1 }
  0x13   : > { %2711 = sst [smem:[#allocation29_spill]] %s2226_s22  ;;  %p2689_p1 = scmp.eq.s32.totalorder %s2339_s23, 0 }
  0x14   : > { %p326_p2 = scmp.lt.s32.totalorder %s2226_s22, 3  ;;  %s2228_s25 = smov [#allocation11]  }
  0x15   : > { %s338_s26 = sshll.u32 %s2228_s25, 4  ;;  %s2229_s28 = smov [#allocation14]   ;;  %s339_s26 = int_to_ptr.vmem [resolvable:$true] %s338_s26 }
  0x16   : > { %p2344_p3 = pnand %p1544_p0, %p326_p2  ;;  %s362_s29 = sshll.u32 %s2229_s28, 4  ;;  %s363_s29 = int_to_ptr.vmem [resolvable:$true] %s362_s29 }
  0x17   : > { %s2230_s30 = smov [#allocation17]   ;;  %s1901_s14 = scalar_lea.vmem %s339_s26, 256 }
  0x18   : > { %s2712_s24 = scalar_select %p2344_p3, 1, 0 }
  0x19   : > { %p1749_p4 = pneg %p2344_p3  ;;  %s386_s12 = sshll.u32 %s2230_s30, 4  ;;  %s387_s12 = int_to_ptr.vmem [resolvable:$true] %s386_s12 }
  0x1a   : > { %p1902_p8 = scmp.ne.s32.totalorder %s339_s26, %s1901_s14  ;;  %p1909_p11 = scmp.lt.s32.totalorder %s339_s26, %s339_s26 }
  0x1b   : > { %p2353_p6 = pnand %p1749_p4, %p2689_p1  ;;  %p1910_p12 = scmp.lt.s32.totalorder %s1901_s14, %s1901_s14 }
  0x1d   : > { %s2713_s27 = scalar_select %p2353_p6, 1, 0 }
  0x1e   : > { %p2359_p7 = pneg %p2353_p6  ;;  %p1911_p13 = por %p1910_p12, %p1909_p11 }
  0x20   : > { %p1904_p9 = pnand %p1902_p8, %p2359_p7 }
  0x22   : > { %p1905_p10 = pneg %p1904_p9 }
  0x24   : > { %p1912_p0 = pnand %p1911_p13, %p1905_p10 }
  0x26   : > { %1915 = shalt.err (!%p1912_p0)
}
  0x27   : > { %s2231_s15 = smov 64   ;;  %s2232_s16 = smov 4  }
  0x28   : > { %s2715_s3 = sld [smem:[#allocation33_spill]]  ;;  %s1927_s30 = scalar_lea.vmem %s363_s29, 256 }
  0x29   : > { %p1928_p2 = scmp.ne.s32.totalorder %s363_s29, %s1927_s30  ;;  %p1935_p9 = scmp.lt.s32.totalorder %s363_s29, %s363_s29 }
  0x2a   : > { %p1936_p5 = scmp.lt.s32.totalorder %s1927_s30, %s1927_s30 }
  0x2b   : > { %p1930_p4 = pnand %p1928_p2, %p2359_p7 }
  0x2c   : > { %p1937_p1 = por %p1936_p5, %p1935_p9 }
  0x2d   : > { %p1931_p8 = pneg %p1930_p4 }
  0x2e   : > { %1752 = dma.hbm_to_vmem [thread:$0]  (!%p2353_p6), %s2715_s3, 256, %s339_s26, [#allocation12], %s2231_s15, %s2231_s15, %s2232_s16  }
  0x2f   : > { %p1938_p11 = pnand %p1937_p1, %p1931_p8 }
  0x31   : > { %1941 = shalt.err (!%p1938_p11)
}
  0x32   : > { %s2716_s5 = sld [smem:[#allocation34_spill]]  ;;  %s1953_s25 = scalar_lea.vmem %s387_s12, 256 }
  0x33   : > { %p1954_p10 = scmp.ne.s32.totalorder %s387_s12, %s1953_s25  ;;  %p1961_p0 = scmp.lt.s32.totalorder %s387_s12, %s387_s12 }
  0x34   : > { %p1962_p2 = scmp.lt.s32.totalorder %s1953_s25, %s1953_s25 }
  0x35   : > { %p1956_p12 = pnand %p1954_p10, %p2359_p7 }
  0x36   : > { %p1963_p4 = por %p1962_p2, %p1961_p0 }
  0x37   : > { %p1957_p13 = pneg %p1956_p12 }
  0x38   : > { %1758 = dma.hbm_to_vmem [thread:$0]  (!%p2353_p6), %s2716_s5, 256, %s363_s29, [#allocation15], %s2231_s15, %s2231_s15, %s2232_s16  }
  0x39   : > { %p1964_p3 = pnand %p1963_p4, %p1957_p13 }
  0x3b   : > { %1967 = shalt.err (!%p1964_p3)
}
  0x3c   : > { %s2717_s7 = sld [smem:[#allocation35_spill]]  ;;  %s1543_s11 = sadd.s32 4294967294, %s2226_s22  }
  0x3d   : > { %s45_s29 = sadd.s32 1, %s2222_s21  ;;  %s54_s30 = sadd.s32 1, %s2214_s19 }
  0x3e   : > { %p47_p1 = scmp.ge.s32.totalorder %s45_s29, 2  ;;  %p61_p3 = scmp.ne.s32.totalorder %s2214_s19, %s2210_s18 }
  0x3f   : > { %p62_p5 = scmp.eq.s32.totalorder %s2226_s22, 0  ;;  %p67_p8 = scmp.ne.s32.totalorder %s2210_s18, %s2206_s17 }
  0x40   : > { %s2754_s29 = smov (%p47_p1, %s45_s29), 0  ;;  %p2720_p11 = scmp.eq.s32.totalorder %s2339_s23, 0 }
  0x41   : > { %2718 = sst [smem:[#allocation30_spill]] %s2754_s29  ;;  %p2394_p9 = por %p62_p5, %p61_p3 }
  0x42   : > { %1764 = dma.hbm_to_vmem [thread:$0]  (!%p2353_p6), %s2717_s7, 256, %s387_s12, [#allocation18], %s2231_s15, %s2231_s15, %s2232_s16  }
  0x43   : > { %p2400_p10 = por %p2720_p11, %p67_p8  ;;  %s49_s15 = ssub.s32 %s2222_s21, %s2754_s29 }
  0x44   : > { %p313_p12 = scmp.eq.s32.totalorder %s2339_s23, 1  ;;  %p52_p13 = scmp.eq.s32.totalorder %s49_s15, 0 }
  0x45   : > { %s2721_s12 = scalar_select %p2400_p10, 1, 0 }
  0x46   : > { %p319_p0 = scmp.eq.s32.totalorder %s1543_s11, 1  ;;  %p2407_p2 = por %p313_p12, %p61_p3 }
  0x47   : > { %p1788_p4 = scmp.lt.s32.totalorder %s2226_s22, 2  ;;  %s2694_s28 = sand.u32 1, %s2214_s19  }
  0x48   : > { %s2722_s16 = scalar_select %p2407_p2, 1, 0 }
  0x49   : > { %s2413_s25 = scalar_select %p52_p13, %s2214_s19, %s54_s30  }
  0x4a   : > { %p2415_p1 = por %p319_p0, %p67_p8  ;;  %s2422_s3 = sshll.u32 %s2694_s28, 2 }
  0x4b   : > { %2723 = sst [smem:[#allocation31_spill]] %s2413_s25  ;;  %s2425_s5 = sshll.u32 %s2222_s21, 6 }
  0x4c   : > { %s2724_s26 = scalar_select %p2415_p1, 1, 0 }
  0x4d   : > { %p2429_p3 = pnand %p1788_p4, %p2394_p9  ;;  %s436_s30 = sand.u32 1, %s2226_s22  }
  0x4e   : > { %2725 = sst [smem:[#allocation32_spill]] %s2724_s26  ;;  %s445_s29 = scalar_lea.hbm %s2678_s1, %s2425_s5 }
  0x4f   : > { %s440_s25 = scalar_lea.vmem [#allocation8], %s2422_s3  ;;  %s2233_s28 = smov [#allocation13]  }
  0x50   : > { %s447_s26 = sshll.u32 %s440_s25, 4  ;;  %s352_s17 = sshll.u32 %s2233_s28, 4  ;;  %s448_s26 = int_to_ptr.vmem [resolvable:$true] %s447_s26  ;;  %s353_s17 = int_to_ptr.vmem [resolvable:$true] %s352_s17 }
  0x51   : > { %s2439_s21 = scalar_lea.sflag [#allocation9], %s436_s30  ;;  %p2699_p5 = pneg %p2429_p3 }
  0x52   : > { %s1981_s14 = scalar_lea.vmem %s448_s26, 64  ;;  %s2234_s22 = smov [#allocation8]  }
  0x53   : > { %p1982_p8 = scmp.ne.s32.totalorder %s448_s26, %s1981_s14  ;;  %s1986_s10 = sshll.u32 %s2234_s22, 4  ;;  %s1987_s10 = int_to_ptr.vmem [resolvable:$false] %s1986_s10 }
  0x54   : > { %s1988_s7 = scalar_lea.vmem %s1987_s10, 128  ;;  %p1989_p12 = scmp.lt.s32.totalorder %s448_s26, %s1987_s10 }
  0x55   : > { %p1984_p9 = pnand %p1982_p8, %p2699_p5  ;;  %p1990_p13 = scmp.lt.s32.totalorder %s1988_s7, %s1981_s14 }
  0x57   : > { %p1985_p11 = pneg %p1984_p9  ;;  %p1991_p0 = por %p1990_p13, %p1989_p12 }
  0x59   : > { %p1992_p4 = pnand %p1991_p0, %p1985_p11 }
  0x5b   : > { %1995 = shalt.err (!%p1992_p4)
}
  0x5c   : > { %1774 = dma.hbm_to_vmem [thread:$0]  (!%p2429_p3), %s445_s29, 64, %s448_s26, %s2439_s21  }
  0x5d   : > { %s2007_s25 = scalar_lea.vmem %s353_s17, 16  ;;  %s2014_s28 = scalar_lea.vmem %s353_s17, 32 }
  0x5e   : > { %p2008_p1 = scmp.ne.s32.totalorder %s353_s17, %s2007_s25  ;;  %p2015_p5 = scmp.lt.s32.totalorder %s353_s17, %s353_s17 }
  0x5f   : > { %p2016_p2 = scmp.lt.s32.totalorder %s2014_s28, %s2007_s25 }
  0x60   : > { %p2010_p8 = pnand %p2008_p1, %p2359_p7 }
  0x61   : > { %p2017_p10 = por %p2016_p2, %p2015_p5 }
  0x62   : > { %p2011_p9 = pneg %p2010_p8 }
  0x64   : > { %p2018_p6 = pnand %p2017_p10, %p2011_p9 }
  0x66   : > { %2021 = shalt.err (!%p2018_p6)
}
  0x67   : > { %p2727_p11 = scmp.ne.s32.totalorder %s2713_s27, 0  ;;  %s2235_s29 = smov [#allocation16]  }
  0x68   : > { %s376_s26 = sshll.u32 %s2235_s29, 4  ;;  %s2236_s30 = smov [#allocation19]   ;;  %s377_s26 = int_to_ptr.vmem [resolvable:$true] %s376_s26 }
  0x69   : > { %1755 = dma.hbm_to_vmem [thread:$0]  (!%p2727_p11), %s2681_s4, 16, %s353_s17, [#allocation12]  }
  0x6a   : > { %s400_s15 = sshll.u32 %s2236_s30, 4  ;;  %s2033_s14 = scalar_lea.vmem %s377_s26, 16  ;;  %s401_s15 = int_to_ptr.vmem [resolvable:$true] %s400_s15 }
  0x6b   : > { %p2034_p1 = scmp.ne.s32.totalorder %s377_s26, %s2033_s14  ;;  %s2040_s7 = scalar_lea.vmem %s377_s26, 32 }
  0x6c   : > { %p2041_p10 = scmp.lt.s32.totalorder %s377_s26, %s377_s26  ;;  %p2042_p6 = scmp.lt.s32.totalorder %s2040_s7, %s2033_s14 }
  0x6d   : > { %p2036_p12 = pnand %p2034_p1, %p2359_p7 }
  0x6e   : > { %p2043_p2 = por %p2042_p6, %p2041_p10 }
  0x6f   : > { %p2037_p13 = pneg %p2036_p12 }
  0x71   : > { %p2044_p5 = pnand %p2043_p2, %p2037_p13 }
  0x73   : > { %2047 = shalt.err (!%p2044_p5)
}
  0x74   : > { %1761 = dma.hbm_to_vmem [thread:$0]  (!%p2727_p11), %s2683_s6, 16, %s377_s26, [#allocation15]  }
  0x75   : > { %s2059_s28 = scalar_lea.vmem %s401_s15, 16  ;;  %s2066_s10 = scalar_lea.vmem %s401_s15, 32 }
  0x76   : > { %p2060_p0 = scmp.ne.s32.totalorder %s401_s15, %s2059_s28  ;;  %p2067_p9 = scmp.lt.s32.totalorder %s401_s15, %s401_s15 }
  0x77   : > { %p2068_p1 = scmp.lt.s32.totalorder %s2066_s10, %s2059_s28 }
  0x78   : > { %p2062_p4 = pnand %p2060_p0, %p2359_p7 }
  0x79   : > { %p2069_p12 = por %p2068_p1, %p2067_p9 }
  0x7a   : > { %p2063_p8 = pneg %p2062_p4 }
  0x7c   : > { %p2070_p10 = pnand %p2069_p12, %p2063_p8 }
  0x7e   : > { %2073 = shalt.err (!%p2070_p10)
}
  0x7f   : > { %1767 = dma.hbm_to_vmem [thread:$0]  (!%p2727_p11), %s2685_s8, 16, %s401_s15, [#allocation18]  }
  0x80   : > { %s427_s30 = scalar_lea.hbm %s2677_s0, %s2425_s5  ;;  %s421_s14 = scalar_lea.vmem [#allocation5], %s2422_s3 }
  0x81   : > { %s429_s7 = sshll.u32 %s421_s14, 4  ;;  %s463_s27 = scalar_lea.hbm %s2679_s2, %s2425_s5  ;;  %s430_s7 = int_to_ptr.vmem [resolvable:$true] %s429_s7 }
  0x82   : > { %s2728_s28 = sand.u32 1, %s2214_s19   ;;  %s2087_s22 = scalar_lea.vmem %s430_s7, 64 }
  0x83   : > { %s418_s10 = scalar_lea.sflag [#allocation6], %s2728_s28  ;;  %p2088_p7 = scmp.ne.s32.totalorder %s430_s7, %s2087_s22 }
  0x84   : > { %p2729_p13 = pneg %p2429_p3  ;;  %s2237_s15 = smov [#allocation5]  }
  0x85   : > { %s2092_s29 = sshll.u32 %s2237_s15, 4  ;;  %s2093_s29 = int_to_ptr.vmem [resolvable:$false] %s2092_s29 }
  0x86   : > { %p2090_p6 = pnand %p2088_p7, %p2729_p13  ;;  %s2094_s13 = scalar_lea.vmem %s2093_s29, 128 }
  0x87   : > { %p2095_p11 = scmp.lt.s32.totalorder %s430_s7, %s2093_s29  ;;  %p2096_p5 = scmp.lt.s32.totalorder %s2094_s13, %s2087_s22 }
  0x88   : > { %p2091_p2 = pneg %p2090_p6 }
  0x89   : > { %p2097_p0 = por %p2096_p5, %p2095_p11 }
  0x8b   : > { %p2098_p4 = pnand %p2097_p0, %p2091_p2 }
  0x8d   : > { %2101 = shalt.err (!%p2098_p4)
}
  0x8e   : > { %1771 = dma.hbm_to_vmem [thread:$0]  (!%p2429_p3), %s427_s30, 64, %s430_s7, %s418_s10  }
  0x8f   : > { %s458_s26 = scalar_lea.vmem [#allocation10], %s2422_s3  ;;  %p2730_p9 = pmov %p2729_p13 }
  0x90   : > { %s465_s14 = sshll.u32 %s458_s26, 4  ;;  %s2238_s17 = smov [#allocation10]   ;;  %s466_s14 = int_to_ptr.vmem [resolvable:$true] %s465_s14 }
  0x91   : > { %s2115_s25 = scalar_lea.vmem %s466_s14, 64  ;;  %s2120_s28 = sshll.u32 %s2238_s17, 4  ;;  %s2121_s28 = int_to_ptr.vmem [resolvable:$false] %s2120_s28 }
  0x92   : > { %p2116_p8 = scmp.ne.s32.totalorder %s466_s14, %s2115_s25  ;;  %s2122_s22 = scalar_lea.vmem %s2121_s28, 128 }
  0x93   : > { %p2123_p10 = scmp.lt.s32.totalorder %s466_s14, %s2121_s28  ;;  %p2124_p7 = scmp.lt.s32.totalorder %s2122_s22, %s2115_s25 }
  0x94   : > { %p2118_p1 = pnand %p2116_p8, %p2730_p9 }
  0x95   : > { %p2125_p13 = por %p2124_p7, %p2123_p10 }
  0x96   : > { %p2119_p12 = pneg %p2118_p1 }
  0x98   : > { %p2126_p6 = pnand %p2125_p13, %p2119_p12 }
  0x9a   : > { %2129 = shalt.err (!%p2126_p6)
}
  0x9b   : > { %1777 = dma.hbm_to_vmem [thread:$0]  (!%p2429_p3), %s463_s27, 64, %s466_s14, %s2439_s21  }
  0x9c   : > { %p2731_p2 = scmp.ne.s32.totalorder %s2712_s24, 0 }
  0x9d   : > { %s2501_s7 = sand.u32 (!%p2731_p2), 1, %s2210_s18   ;;  %p2732_p11 = scmp.ne.s32.totalorder (!%p2731_p2), %s2721_s12, 0 }
  0x9e   : > { %474 = sbr.rel (%p2731_p2) target bundleno = 1413 (0x585), region = 64  ;;  %s2504_s10 = sshll.u32 (!%p2731_p2), %s2501_s7, 2 }
  0x9f   : > { %s477_s11 = scalar_lea.sflag (!%p2731_p2), [#allocation6], %s2501_s7  ;;  %s480_s15 = scalar_lea.vmem (!%p2731_p2), [#allocation5], %s2504_s10 }
  0xa3   : > { %2181 = dma.done.wait (%p2732_p11), %s477_s11, 64  }
  0xa4   : > { %2183 = vsyncadd (%p2732_p11), %s477_s11, 4294967232  ;;  %s485_s5 = sand.u32 1, %s2339_s23   ;;  %s489_s24 = scalar_lea.vmem [#allocation8], %s2504_s10 }
  0xa5   : > { %s486_s21 = scalar_lea.sflag [#allocation9], %s485_s5 }
  0xa6   : > { %2185 = dma.done.wait (%p2732_p11), %s486_s21, 128  }
  0xa7   : > { %2187 = vsyncadd (%p2732_p11), %s486_s21, 4294967168  ;;  %s498_s27 = scalar_lea.vmem [#allocation10], %s2504_s10  ;;  %p2733_p3 = scmp.eq.s32.totalorder %s2339_s23, 0 }
  0xa9   : > { %2189 = dma.done.wait (%p2733_p3), [#allocation12], 272   ;;  %p2734_p5 = pmov %p2733_p3 }
  0xaa   : > { %p2735_p0 = pmov %p2733_p3 }
  0xab   : > { %2191 = vsyncadd (%p2734_p5), [#allocation12], 4294967024 }
  0xac   : > { %2193 = dma.done.wait (%p2735_p0), [#allocation15], 272   ;;  %p2736_p4 = pmov %p2735_p0 }
  0xad   : > { %p2737_p8 = pmov %p2735_p0 }
  0xae   : > { %2195 = vsyncadd (%p2736_p4), [#allocation15], 4294967024 }
  0xaf   : > { %2197 = dma.done.wait (%p2737_p8), [#allocation18], 272   ;;  %p2738_p9 = pmov %p2735_p0 }
  0xb0   : > { %v2239_v0 = vmov 0.0   ;;  %vm2240_vm0 = vmmov 0   ;;  %v1860_v1 = vld [vmem:[#allocation14 + $0x8] sm:$0xff]   ;;  %v1861_v2 = vld [vmem:[#allocation14] sm:$0xff]   ;;  %vm605_vm1 = vcmask 261120   ;;  %v1862_v4 = vld [vmem:[#allocation11 + $0x8] sm:$0xff]  }
  0xb1   : > { %2199 = vsyncadd (%p2738_p9), [#allocation18], 4294967024  ;;  %1637 = vmatprep.subr.bf16.mxu0 %v2239_v0  ;;  %1641 = vmatprep.mubr.msk.bf16.mxu0 %vm2240_vm0, %v2239_v0  ;;  %v576_v3 = vld [vmem:[%s489_s24] sm:$0xf]  ;;  %v1863_v5 = vld [vmem:[#allocation11] sm:$0xff]   ;;  %vm650_vm2 = vcmask 257024  }
  0xb2   : > { %1645 = vmatprep.subr.bf16.mxu1 %v2239_v0  ;;  %1649 = vmatprep.mubr.msk.bf16.mxu1 %vm2240_vm0, %v2239_v0  ;;  %v716_v6 = vld [vmem:[%s480_s15] sm:$0xf]  ;;  %v581_v9 = vld [vmem:[%s498_s27] sm:$0xf]  ;;  %v1569_v10 = vld [vmem:[#allocation16] ss:$0 sm:$0xff] }
  0xb3   : > { %1638 = vmatpush3.bf16.msra.mxu0 %v1860_v1  ;;  %v1864_v7 = vld [vmem:[#allocation17 + $0x8] sm:$0xff]   ;;  %v1865_v8 = vld [vmem:[#allocation17] sm:$0xff]   ;;  %vm788_vm3 = vcmask 64512   ;;  %s2241_s23 = smov 112   ;;  %s2242_s12 = smov 120   ;;  %vm848_vm4 = vcmask 1043456  }
  0xb4   : > { %1639 = vmatprep.subr.bf16.mxu0 %v2239_v0  ;;  %1646 = vmatpush3.bf16.msra.mxu1 %v1864_v7  ;;  %v1577_v17 = vld [vmem:[#allocation13] ss:$0 sm:$0xff]  ;;  %s2243_s29 = smov 104   ;;  %v1573_v30 = vld [vmem:[#allocation19] ss:$0 sm:$0xff]  ;;  %vm895_vm5 = vcmask 60416  }
  0xb5   : > { %1647 = vmatprep.subr.bf16.mxu1 %v2239_v0  ;;  %s2244_s13 = smov 8   ;;  %s2245_s28 = smov 16   ;;  %vm1023_vm6 = vcmask 126016   ;;  %vm1150_vm7 = vcmask 191616   ;;  %vm1277_vm8 = vcmask 257216  }
  0xb6   : > { %s2246_s22 = smov 24   ;;  %s1568_s3 = sshll.u32 %s2501_s7, 3 }
  0xb7   : > { %1640 = vmatpush3.bf16.msra.mxu0 %v1861_v2  ;;  %s2739_s11 = sld [smem:[#allocation36_spill]]  ;;  %s1603_s15 = sshll.u32 %s2218_s20, 7 }
  0xb8   : > { %1653 = vmatprep.subr.bf16.mxu0 %v2239_v0  ;;  %1648 = vmatpush3.bf16.msra.mxu1 %v1865_v8  ;;  %s570_s5 = scalar_lea.vmem [#allocation20], %s1568_s3  ;;  %p2741_p12 = scmp.ne.s32.totalorder %s2722_s16, 0 }
  0xb9   : > { %1661 = vmatprep.subr.bf16.mxu1 %v2239_v0  ;;  %s1362_s21 = sshll.u32 %s570_s5, 4  ;;  %s2630_s21 = int_to_ptr.vmem [resolvable:$true] %s1362_s21 }
  0xba   : > { %1642 = vmatmul.mubr.msk.bf16.vlgmr.msra.gmra.mxu0 %vm605_vm1, %v576_v3  ;;  %s2130_s20 = scalar_lea.vmem %s2630_s21, 128 }
  0xbb   : > { %1654 = vmatpush3.bf16.msra.mxu0 %v1862_v4  ;;  %1657 = vmatprep.mubr.msk.bf16.mxu0 %vm2240_vm0, %v2239_v0  ;;  %p2131_p1 = scmp.ne.s32.totalorder %s2630_s21, %s2130_s20 }
  0xbc   : > { %1655 = vmatprep.subr.bf16.mxu0 %v2239_v0  ;;  %1650 = vmatmul.mubr.msk.bf16.vlgmr.msra.gmra.mxu1 %vm605_vm1, %v581_v9 }
  0xbd   : > { %1663 = vmatprep.mubr.msk.bf16.mxu1 %vm2240_vm0, %v2239_v0  ;;  %p2132_p10 = pnand %p2131_p1, %p2741_p12 }
  0xbf   : > { %1656 = vmatpush3.bf16.msra.mxu0 %v1863_v5  ;;  %p2133_p7 = pneg %p2132_p10 }
  0xc0   : > { %1667 = vmatprep.subr.bf16.mxu0 %v2239_v0 }
  0xc2   : > { %1658 = vmatmul.mubr.msk.bf16.vlgmr.msra.gmra.mxu0 %vm605_vm1, %v716_v6 }
  0xc3   : > { %1669 = vmatprep.mubr.msk.bf16.mxu0 %vm2240_vm0, %v2239_v0 }
 0x17a   : > { %v643_v11 = vpop.f32.mrf.mxu0 }
 0x17b   : > { %v644_v12 = vadd.f32 %v1569_v10, %v643_v11 }
 0x17c   : > { %v1643_v13 = vpop.f32.mrf.mxu0  ;;  %v708_v31 = vpop.f32.mrf.mxu1 }
 0x17d   : > { %v649_v14 = vpack.c.bf16 %v644_v12, %v644_v12  ;;  %v709_v32 = vadd.f32 %v1573_v30, %v708_v31 }
 0x17e   : > { %v646_v15 = vpop.f32.mrf.mxu0  ;;  %v1651_v33 = vpop.f32.mrf.mxu1 }
 0x17f   : > { %651 = vst.msk [vmem:[#allocation2] sm:$0xf] %vm650_vm2, %v649_v14  ;;  %v714_v34 = vpack.c.bf16 %v709_v32, %v709_v32 }
 0x180   : > { %v1644_v16 = vpop.f32.mrf.mxu0  ;;  %v711_v35 = vpop.f32.mrf.mxu1 }
 0x181   : > { %715 = vst.msk [vmem:[#allocation3] sm:$0xf] %vm650_vm2, %v714_v34 }
 0x182   : > { %v778_v18 = vpop.f32.mrf.mxu0  ;;  %v1652_v36 = vpop.f32.mrf.mxu1 }
 0x183   : > { %v779_v19 = vadd.f32 %v1577_v17, %v778_v18 }
 0x184   : > { %v1659_v20 = vpop.f32.mrf.mxu0 }
 0x185   : > { %v784_v21 = vmul.f32 0.35355338, %v779_v19 }
 0x186   : > { %v781_v22 = vpop.f32.mrf.mxu0  ;;  %v786_v23 = vld [vmem:[#allocation2] sm:$0xf] }
 0x187   : > { %v1866_v24 = vld [vmem:[#allocation2] ss:$0 sps:$4 sm:$0xff]   ;;  %v793_v25 = vsel %vm788_vm3, %v786_v23, 0  ;;  %v785_v27 = vpack.c.bf16 %v784_v21, %v784_v21 }
 0x188   : > { %v1867_v26 = vld [vmem:[#allocation2] ss:$0 sps:$4 sm:$0xff]   ;;  %1662 = vmatpush3.bf16.xpose.msra.mxu1 %v793_v25  ;;  %1032 = vrot.lane.b32.xlu1 %v1866_v24, %s2241_s23  ;;  %v1660_v28 = vpop.f32.mrf.mxu0  ;;  %v787_v37 = vld [vmem:[#allocation3] sm:$0xf] }
 0x189   : > { %905 = vrot.lane.b32.xlu0 %v1867_v26, %s2242_s12  ;;  %1673 = vmatprep.subr.bf16.mxu1 %v2239_v0  ;;  %v1868_v29 = vld [vmem:[#allocation2] ss:$0 sps:$4 sm:$0xff]   ;;  %v850_v38 = vsel %vm848_vm4, %v787_v37, 0  ;;  %v1869_v2 = vld [vmem:[#allocation3] ss:$0 sps:$4 sm:$0xff]  }
 0x18a   : > { %1668 = vmatpush3.bf16.msra.mxu0 %v850_v38  ;;  %v1870_v5 = vld [vmem:[#allocation3] ss:$0 sps:$4 sm:$0xff]  }
 0x18b   : > { %1679 = vmatprep.subr.bf16.mxu0 %v2239_v0  ;;  %v1871_v10 = vld [vmem:[#allocation3] ss:$0 sps:$4 sm:$0xff]  }
 0x18c   : > { %1027 = vrot.lane.b32.xlu1 %v785_v27, %s2241_s23 }
 0x18d   : > { %900 = vrot.lane.b32.xlu0 %v785_v27, %s2242_s12 }
 0x18f   : > { %1664 = vmatmul.mubr.msk.bf16.vlgmr.msra.gmra.mxu1 %vm788_vm3, %v785_v27 }
 0x190   : > { %1154 = vrot.lane.b32.xlu1 %v785_v27, %s2243_s29  ;;  %1675 = vmatprep.mubr.msk.bf16.mxu1 %vm2240_vm0, %v2239_v0 }
 0x191   : > { %1159 = vrot.lane.b32.xlu0 %v1868_v29, %s2243_s29 }
 0x1fa   : > { %v1033_v41 = vpop.permute.xlu1 %1032 }
 0x1fb   : > { %v906_v39 = vpop.permute.xlu0 %905  ;;  %v1038_v43 = vsel %vm788_vm3, %v1033_v41, 0 }
 0x1fc   : > { %v911_v40 = vsel %vm788_vm3, %v906_v39, 0 }
 0x1fd   : > { %1674 = vmatpush3.bf16.xpose.msra.mxu1 %v911_v40 }
 0x1fe   : > { %1685 = vmatprep.subr.bf16.mxu1 %v2239_v0  ;;  %v1028_v45 = vpop.permute.xlu1 %1027 }
 0x1ff   : > { %v901_v42 = vpop.permute.xlu0 %900 }
 0x202   : > { %v1155_v47 = vpop.permute.xlu1 %1154 }
 0x203   : > { %v1160_v44 = vpop.permute.xlu0 %1159 }
 0x204   : > { %1676 = vmatmul.mubr.msk.bf16.vlgmr.msra.gmra.mxu1 %vm788_vm3, %v901_v42  ;;  %v1165_v46 = vsel %vm788_vm3, %v1160_v44, 0 }
 0x205   : > { %1686 = vmatpush3.bf16.xpose.msra.mxu1 %v1038_v43  ;;  %1687 = vmatprep.mubr.msk.bf16.mxu1 %vm2240_vm0, %v2239_v0 }
 0x206   : > { %1697 = vmatprep.subr.bf16.mxu1 %v2239_v0 }
 0x20c   : > { %1688 = vmatmul.mubr.msk.bf16.vlgmr.msra.gmra.mxu1 %vm788_vm3, %v1028_v45 }
 0x20d   : > { %1698 = vmatpush3.bf16.xpose.msra.mxu1 %v1165_v46  ;;  %1699 = vmatprep.mubr.msk.bf16.mxu1 %vm2240_vm0, %v2239_v0 }
 0x20e   : > { %1709 = vmatprep.subr.bf16.mxu1 %v2239_v0 }
 0x214   : > { %1700 = vmatmul.mubr.msk.bf16.vlgmr.msra.gmra.mxu1 %vm788_vm3, %v1155_v47 }
 0x215   : > { %1713 = vmatprep.mubr.msk.bf16.mxu1 %vm2240_vm0, %v2239_v0 }
 0x24f   : > { %v829_v48 = vpop.f32.mrf.mxu1 }
 0x250   : > { %v835_v49 = vsel %vm788_vm3, %v829_v48, -inf }
 0x251   : > { %836 = vmax.xlane.f32.xlu0 %v835_v49  ;;  %v1665_v50 = vpop.f32.mrf.mxu1 }
 0x253   : > { %v832_v51 = vpop.f32.mrf.mxu1 }
 0x255   : > { %v1666_v52 = vpop.f32.mrf.mxu1 }
 0x2c4   : > { %v947_v53 = vpop.f32.mrf.mxu1 }
 0x2c5   : > { %v953_v54 = vsel %vm788_vm3, %v947_v53, -inf }
 0x2c6   : > { %954 = vmax.xlane.f32.xlu1 %v953_v54  ;;  %v1677_v55 = vpop.f32.mrf.mxu1 }
 0x2c8   : > { %v950_v56 = vpop.f32.mrf.mxu1 }
 0x2ca   : > { %v1678_v57 = vpop.f32.mrf.mxu1 }
 0x2cc   : > { %v1074_v58 = vpop.f32.mrf.mxu1 }
 0x2cd   : > { %v1080_v59 = vsel %vm788_vm3, %v1074_v58, -inf }
 0x2ce   : > { %1081 = vmax.xlane.f32.xlu0 %v1080_v59  ;;  %v1689_v60 = vpop.f32.mrf.mxu1 }
 0x2d0   : > { %v1077_v61 = vpop.f32.mrf.mxu1 }
 0x2d1   : > { %v1873_v61 = vld [vmem:[%s2686_s9] sm:$0xff]  }
 0x2d2   : > { %v1690_v62 = vpop.f32.mrf.mxu1 }
 0x2d4   : > { %v1201_v63 = vpop.f32.mrf.mxu1 }
 0x2d5   : > { %v1207_v1 = vsel %vm788_vm3, %v1201_v63, -inf }
 0x2d6   : > { %1208 = vmax.xlane.f32.xlu0 %v1207_v1  ;;  %v1701_v3 = vpop.f32.mrf.mxu1 }
 0x2d7   : > { %966 = vrot.lane.b32.xlu1 %v1869_v2, %s2242_s12 }
 0x2d8   : > { %v1204_v4 = vpop.f32.mrf.mxu1 }
 0x2da   : > { %v837_v6 = vpop.xlane.xlu0 %836  ;;  %v1702_v7 = vpop.f32.mrf.mxu1 }
 0x2db   : > { %v838_v8 = vsub.f32 %v829_v48, %v837_v6  ;;  %1220 = vrot.lane.b32.xlu1 %v1870_v5, %s2243_s29  ;;  %s1348_s29 = scalar_lea.sflag [#allocation7], %s2501_s7 }
 0x2dd   : > { %v839_v9 = vmul.f32 1.442695, %v838_v8 }
 0x2df   : > { %1874 = vpow2.f32 %v839_v9 }
 0x2ec   : > { %v1875_v11 = vpop.eup %1874  ;;  %1093 = vrot.lane.b32.xlu0 %v1871_v10, %s2241_s23  ;;  %s2740_s23 = sld [smem:[#allocation37_spill]] }
 0x2ed   : > { %v844_v12 = vpack.c.bf16 %v1875_v11, %v1875_v11  ;;  %v841_v29 = vsel %vm788_vm3, %v1875_v11, 0.0 }
 0x2ef   : > { %1670 = vmatmul.mubr.msk.bf16.vlgmr.msra.gmra.mxu0 %vm788_vm3, %v844_v12  ;;  %v1598_v12 = vld [vmem:[%s2739_s11] ss:$0 sm:$0xff] }
 0x2f0   : > { %1681 = vmatprep.mubr.msk.bf16.mxu0 %vm2240_vm0, %v2239_v0 }
 0x2f2   : > { %s2628_s12 = scalar_lea.hbm %s2740_s23, %s1603_s15 }
 0x34f   : > { %v955_v13 = vpop.xlane.xlu1 %954 }
 0x350   : > { %v956_v14 = vsub.f32 %v947_v53, %v955_v13 }
 0x352   : > { %v957_v15 = vmul.f32 1.442695, %v956_v14 }
 0x353   : > { %v967_v16 = vpop.permute.xlu1 %966 }
 0x354   : > { %1876 = vpow2.f32 %v957_v15  ;;  %v972_v17 = vsel %vm848_vm4, %v967_v16, 0 }
 0x355   : > { %1680 = vmatpush3.bf16.msra.mxu0 %v972_v17 }
 0x356   : > { %1691 = vmatprep.subr.bf16.mxu0 %v2239_v0 }
 0x357   : > { %v1082_v18 = vpop.xlane.xlu0 %1081  ;;  %v1221_v31 = vpop.permute.xlu1 %1220 }
 0x358   : > { %v1083_v19 = vsub.f32 %v1074_v58, %v1082_v18  ;;  %v1226_v34 = vsel %vm848_vm4, %v1221_v31, 0  ;;  %v1872_v58 = vld [vmem:[%s2686_s9 + $0x8] sm:$0xff]  }
 0x359   : > { %1710 = vmatpush3.bf16.msra.mxu1 %v1872_v58 }
 0x35a   : > { %v1084_v20 = vmul.f32 1.442695, %v1083_v19  ;;  %1711 = vmatprep.subr.bf16.mxu1 %v2239_v0 }
 0x35c   : > { %1878 = vpow2.f32 %v1084_v20 }
 0x35d   : > { %1712 = vmatpush3.bf16.msra.mxu1 %v1873_v61 }
 0x35f   : > { %v1209_v21 = vpop.xlane.xlu0 %1208 }
 0x360   : > { %v1210_v22 = vsub.f32 %v1201_v63, %v1209_v21 }
 0x361   : > { %v1877_v23 = vpop.eup %1876 }
 0x362   : > { %v1211_v24 = vmul.f32 1.442695, %v1210_v22  ;;  %v959_v25 = vsel %vm788_vm3, %v1877_v23, 0.0  ;;  %v962_v26 = vpack.c.bf16 %v1877_v23, %v1877_v23 }
 0x363   : > { %960 = vadd.xlane.f32.xlu1 %v959_v25  ;;  %v1094_v27 = vpop.permute.xlu0 %1093 }
 0x364   : > { %1880 = vpow2.f32 %v1211_v24  ;;  %v1099_v28 = vsel %vm848_vm4, %v1094_v27, 0  ;;  %1682 = vmatmul.mubr.msk.bf16.vlgmr.msra.gmra.mxu0 %vm788_vm3, %v962_v26 }
 0x365   : > { %1692 = vmatpush3.bf16.msra.mxu0 %v1099_v28  ;;  %1693 = vmatprep.mubr.msk.bf16.mxu0 %vm2240_vm0, %v2239_v0 }
 0x366   : > { %1703 = vmatprep.subr.bf16.mxu0 %v2239_v0 }
 0x367   : > { %842 = vadd.xlane.f32.xlu1 %v841_v29 }
 0x369   : > { %v1879_v30 = vpop.eup %1878 }
 0x36a   : > { %v1086_v32 = vsel %vm788_vm3, %v1879_v30, 0.0  ;;  %v1089_v33 = vpack.c.bf16 %v1879_v30, %v1879_v30 }
 0x36b   : > { %1087 = vadd.xlane.f32.xlu0 %v1086_v32 }
 0x36c   : > { %1694 = vmatmul.mubr.msk.bf16.vlgmr.msra.gmra.mxu0 %vm788_vm3, %v1089_v33 }
 0x36d   : > { %1704 = vmatpush3.bf16.msra.mxu0 %v1226_v34  ;;  %1705 = vmatprep.mubr.msk.bf16.mxu0 %vm2240_vm0, %v2239_v0 }
 0x371   : > { %v1881_v35 = vpop.eup %1880 }
 0x372   : > { %v1213_v36 = vsel %vm788_vm3, %v1881_v35, 0.0  ;;  %v1216_v37 = vpack.c.bf16 %v1881_v35, %v1881_v35 }
 0x373   : > { %1214 = vadd.xlane.f32.xlu0 %v1213_v36 }
 0x374   : > { %1706 = vmatmul.mubr.msk.bf16.vlgmr.msra.gmra.mxu0 %vm788_vm3, %v1216_v37 }
 0x3af   : > { %v886_v38 = vpop.f32.mrf.mxu0 }
 0x3b1   : > { %v1671_v39 = vpop.f32.mrf.mxu0 }
 0x3b3   : > { %v889_v40 = vpop.f32.mrf.mxu0 }
 0x3b5   : > { %v1672_v41 = vpop.f32.mrf.mxu0 }
 0x3ec   : > { %v961_v42 = vpop.xlane.xlu1 %960 }
 0x3f0   : > { %v843_v43 = vpop.xlane.xlu1 %842 }
 0x3f1   : > { %1882 = vrcp.f32 %v843_v43 }
 0x3f2   : > { %1884 = vrcp.f32 %v961_v42 }
 0x3f4   : > { %v1088_v47 = vpop.xlane.xlu0 %1087 }
 0x3f5   : > { %1886 = vrcp.f32 %v1088_v47 }
 0x3fc   : > { %v1215_v49 = vpop.xlane.xlu0 %1214 }
 0x3fd   : > { %1888 = vrcp.f32 %v1215_v49 }
 0x3fe   : > { %v1883_v44 = vpop.eup %1882 }
 0x3ff   : > { %v893_v45 = vmul.f32 %v1883_v44, %v886_v38  ;;  %v1885_v48 = vpop.eup %1884 }
 0x401   : > { %v894_v46 = vpack.c.bf16 %v893_v45, %v893_v45 }
 0x402   : > { %v1887_v56 = vpop.eup %1886 }
 0x403   : > { %896 = vst.msk [vmem:[#allocation4] sm:$0xf] %vm895_vm5, %v894_v46 }
 0x40a   : > { %v1889_v2 = vpop.eup %1888 }
 0x424   : > { %v1008_v50 = vpop.f32.mrf.mxu0 }
 0x425   : > { %v1015_v51 = vmul.f32 %v1885_v48, %v1008_v50 }
 0x426   : > { %v1683_v52 = vpop.f32.mrf.mxu0 }
 0x427   : > { %v1606_v53 = vpack.c.bf16 %v1015_v51, %v1015_v51 }
 0x428   : > { %v1011_v54 = vpop.f32.mrf.mxu0 }
 0x429   : > { %1020 = vrot.lane.b32.xlu0 %v1606_v53, %s2244_s13  ;;  %s2247_s13 = smov [#allocation20]  }
 0x42a   : > { %v1684_v55 = vpop.f32.mrf.mxu0  ;;  %s2134_s26 = sshll.u32 %s2247_s13, 4  ;;  %s2135_s26 = int_to_ptr.vmem [resolvable:$false] %s2134_s26 }
 0x42b   : > { %s2136_s14 = scalar_lea.vmem %s2135_s26, 256  ;;  %p2137_p13 = scmp.lt.s32.totalorder %s2630_s21, %s2135_s26 }
 0x42c   : > { %v1135_v57 = vpop.f32.mrf.mxu0  ;;  %p2138_p6 = scmp.lt.s32.totalorder %s2136_s14, %s2130_s20 }
 0x42d   : > { %v1142_v59 = vmul.f32 %v1887_v56, %v1135_v57 }
 0x42e   : > { %v1695_v60 = vpop.f32.mrf.mxu0  ;;  %p2139_p2 = por %p2138_p6, %p2137_p13 }
 0x42f   : > { %v1607_v62 = vpack.c.bf16 %v1142_v59, %v1142_v59 }
 0x430   : > { %v1138_v63 = vpop.f32.mrf.mxu0  ;;  %p2140_p11 = pnand %p2139_p2, %p2133_p7 }
 0x431   : > { %1147 = vrot.lane.b32.xlu1 %v1607_v62, %s2245_s28 }
 0x432   : > { %v1696_v1 = vpop.f32.mrf.mxu0 }
 0x434   : > { %v1262_v3 = vpop.f32.mrf.mxu0 }
 0x435   : > { %v1269_v4 = vmul.f32 %v1889_v2, %v1262_v3 }
 0x436   : > { %v1707_v5 = vpop.f32.mrf.mxu0 }
 0x437   : > { %v1608_v6 = vpack.c.bf16 %v1269_v4, %v1269_v4 }
 0x438   : > { %v1265_v7 = vpop.f32.mrf.mxu0 }
 0x439   : > { %1274 = vrot.lane.b32.xlu1 %v1608_v6, %s2246_s22 }
 0x43a   : > { %v1708_v8 = vpop.f32.mrf.mxu0 }
 0x49b   : > { %v1021_v9 = vpop.permute.xlu0 %1020 }
 0x49c   : > { %1024 = vst.msk [vmem:[#allocation4] sm:$0xf] %vm1023_vm6, %v1021_v9 }
 0x4a3   : > { %v1148_v0 = vpop.permute.xlu1 %1147 }
 0x4a4   : > { %1151 = vst.msk [vmem:[#allocation4] sm:$0xf] %vm1150_vm7, %v1148_v0 }
 0x4ab   : > { %v1275_v10 = vpop.permute.xlu1 %1274 }
 0x4ac   : > { %1278 = vst.msk [vmem:[#allocation4] sm:$0xf] %vm1277_vm8, %v1275_v10 }
 0x4b3   : > { %v1279_v11 = vld [vmem:[#allocation4] sm:$0xf] }
 0x4b4   : > { %1714 = vmatmul.mubr.msk.bf16.vlgmr.msra.gmra.mxu1 %vm605_vm1, %v1279_v11 }
 0x574   : > { %v1340_v13 = vpop.f32.mrf.mxu1 }
 0x575   : > { %v1341_v14 = vadd.f32 %v1598_v12, %v1340_v13 }
 0x576   : > { %v1715_v15 = vpop.f32.mrf.mxu1 }
 0x577   : > { %1346 = vst.msk [vmem:[%s570_s5] sm:$0xff] %vm605_vm1, %v1341_v14 }
 0x578   : > { %v1343_v16 = vpop.f32.mrf.mxu1 }
 0x579   : > { %2143 = shalt.err (!%p2140_p11)
}
 0x57a   : > { %s2144_s25 = scalar_lea.hbm %s2628_s12, 128  ;;  %s2148_s28 = scalar_lea.hbm %s2740_s23, 256 }
 0x57b   : > { %p2145_p3 = scmp.ne.s32.totalorder %s2628_s12, %s2144_s25  ;;  %p2149_p4 = scmp.lt.s32.totalorder %s2628_s12, %s2740_s23 }
 0x57c   : > { %p2150_p8 = scmp.lt.s32.totalorder %s2148_s28, %s2144_s25 }
 0x57d   : > { %p2146_p5 = pnand %p2145_p3, %p2741_p12 }
 0x57e   : > { %p2151_p9 = por %p2150_p8, %p2149_p4 }
 0x57f   : > { %p2147_p0 = pneg %p2146_p5 }
 0x581   : > { %p2152_p1 = pnand %p2151_p9, %p2147_p0 }
 0x583   : > { %2155 = shalt.err (!%p2152_p1)
}
 0x584   : > { %1747 = dma.vmem_to_hbm [thread:$0]  (%p2741_p12), %s2630_s21, 128, %s2628_s12, %s1348_s29   ;;  %v1716_v17 = vpop.f32.mrf.mxu1 }
 0x585 PF: > { %s2742_s30 = sld [smem:[#allocation27_spill]] }
 0x586   : > { %s2743_s10 = sld [smem:[#allocation32_spill]] }
 0x587   : > { %s2744_s11 = sld [smem:[#allocation29_spill]] }
 0x58b   : > { %s1374_s15 = sand.u32 1, %s2742_s30  }
 0x58c   : > { %p2745_p10 = scmp.ne.s32.totalorder %s2743_s10, 0  ;;  %s1375_s5 = scalar_lea.sflag [#allocation7], %s1374_s15 }
 0x58d   : > { %p2746_p7 = scmp.ge.s32.totalorder %s2744_s11, 2 }
 0x58f   : > { %p1779_p13 = pnand %p2746_p7, %p2745_p10 }
 0x591   : > { %p1780_p6 = pneg %p1779_p13 }
 0x593   : > { %2201 = dma.done.wait (%p1780_p6), %s1375_s5, 128  }
 0x594   : > { %2203 = vsyncadd (%p1780_p6), %s1375_s5, 4294967168  ;;  %s33_s22 = sadd.s32 1, %s2744_s11   ;;  %s2747_s16 = sld [smem:[#allocation31_spill]] }
 0x595   : > { %p30_p2 = scmp.ge.s32.totalorder %s33_s22, 4   ;;  %s2748_s20 = sld [smem:[#allocation28_spill]] }
 0x596   : > { %s2749_s21 = sld [smem:[#allocation30_spill]]  ;;  %s2750_s17 = smov %s2210_s18 }
 0x597   : > { %s2751_s18 = smov %s2214_s19  ;;  %32 = sbr.rel (!%p30_p2) target bundleno = 17 (0x11), region = 161 }
 0x59a   : > { %s2752_s19 = smov %s2747_s16 }
 0x59c   :  { %1380 = vsyncpa [#allocation6], 1 }
 0x59d   :  { %1382 = vsyncpa [#allocation6 + $0x1], 1 }
 0x59e   :  { %1383 = vsyncpa [#allocation9], 1 }
 0x59f   :  { %1385 = vsyncpa [#allocation9 + $0x1], 1 }
 0x5a0   :  { %1386 = vsyncpa [#allocation12], 1 }
 0x5a1   :  { %1387 = vsyncpa [#allocation15], 1 }
 0x5a2   :  { %1388 = vsyncpa [#allocation18], 1 }
 0x5a3   :  { %1389 = vsyncpa [#allocation7], 1 }
 0x5a4   :  { %1391 = vsyncpa [#allocation7 + $0x1], 1 }

</bundles_post_ra>
